<compile_context>
chip_gen: v6e
topology: v6e:2x2x1
jax: 0.10.0
libtpu: 0.0.40
codegen_flags: <defaults>
</compile_context>

<pallas_src>
import jax
import jax.numpy as jnp
from jax.experimental import pallas as pl
from jax.experimental.pallas import tpu as pltpu

_LANE = 128
# Per-step VMEM footprint ~ (IN+1)*TB*4 bytes, double-buffered -> ~24*TB bytes
# for IN=2.  TB_MAX=262144 keeps that near ~6 MiB: safely below v5e's 16 MiB
# scoped VMEM default (and v6e/v7x's 32 MiB) without any compiler flags.
_TB_MAX = 262144


def linear_kernel(w_ref, b_ref, xt_ref, o_ref):
    # w_ref : SMEM (IN,)     -- flattened weight row of nn.Linear(IN, 1)
    # b_ref : SMEM (1,)      -- bias
    # xt_ref: VMEM (IN, TB)  -- activations, batch along lanes
    # o_ref : VMEM (1, TB)   -- lane-dense output block
    #
    # Read each input row as its own ref slice (no sublane re-select of a
    # materialized, sublane-padded (IN->8, TB) value) and accumulate in f32.
    acc = xt_ref[0:1, :].astype(jnp.float32) * w_ref[0]
    for k in range(1, xt_ref.shape[0]):           # IN is static (== 2)
        acc = acc + xt_ref[k:k + 1, :].astype(jnp.float32) * w_ref[k]
    o_ref[...] = (acc + b_ref[0].astype(jnp.float32)).astype(o_ref.dtype)


def _pick_tb(b_padded):
    """Largest lane-aligned tile dividing b_padded, capped at _TB_MAX, with a
    preference for >= 2 grid steps so v7x's two TensorCores both get work."""
    assert b_padded % _LANE == 0
    if b_padded <= 2 * _LANE:
        return b_padded                            # tiny batch: single step
    cap = min(_TB_MAX, b_padded // 2)              # >= 2 steps when possible
    m = b_padded // _LANE
    for d in range(cap // _LANE, 0, -1):
        if m % d == 0:
            return d * _LANE
    return _LANE


def linear_forward_lane_dense(xt, w, b):
    """Core fast path: activations already in lane-dense layout.

    xt: (IN, B), w: (1, IN), b: (1,)  ->  (1, B).
    No per-call relayouts; keep this layout across the surrounding model.
    """
    IN, B = xt.shape
    OUT = w.shape[0]
    assert OUT == 1 and w.shape[1] == IN, "CustomModel uses nn.Linear(2, 1)"

    w_flat = w.reshape(IN)
    b_flat = b.reshape(OUT)

    # Ragged-tail handling: pad the lane (batch) axis to a multiple of 128
    # instead of ever falling back to a single full-array block.
    b_padded = ((B + _LANE - 1) // _LANE) * _LANE
    if b_padded != B:
        xt = jnp.pad(xt, ((0, 0), (0, b_padded - B)))

    tb = _pick_tb(b_padded)
    grid = (b_padded // tb,)

    y = pl.pallas_call(
        linear_kernel,
        out_shape=jax.ShapeDtypeStruct((1, b_padded), xt.dtype),
        grid=grid,
        in_specs=[
            # Tiny parameter arrays -> SMEM, read as scalars inside the kernel.
            pl.BlockSpec(memory_space=pltpu.MemorySpace.SMEM),   # w (IN,)
            pl.BlockSpec(memory_space=pltpu.MemorySpace.SMEM),   # b (1,)
            # Activations: (IN, TB) block, batch tiled along lanes.
            pl.BlockSpec((IN, tb), lambda i: (0, i)),
        ],
        out_specs=pl.BlockSpec((1, tb), lambda i: (0, i)),
        compiler_params=pltpu.CompilerParams(
            # Batch axis is embarrassingly parallel; with >= 2 grid steps the
            # two v7x TensorCores each take a share (no-op on v5e/v6e).
            dimension_semantics=("parallel",),
        ),
    )(w_flat, b_flat, xt)

    return y[:, :B] if b_padded != B else y


def linear_forward(x, w, b):
    """Spec-compatible wrapper: x (B, IN) -> (B, 1), like nn.Linear(2, 1).

    The x.T / reshape here are pure layout plumbing over lane-padded (B, 2) /
    (B, 1) arrays; in a real model keep activations in the (IN, B) lane-dense
    layout end-to-end and call linear_forward_lane_dense directly.
    """
    # TODO(synk): hoist this relayout into the producer/consumer of this layer.
    B = x.shape[0]
    return linear_forward_lane_dense(x.T, w, b).reshape(B, 1)


if __name__ == "__main__":
    key = jax.random.PRNGKey(0)
    kx, kw, kb = jax.random.split(key, 3)

    # nn.Linear(2, 1); small demo batch.  _pick_tb -> tb=512, grid=(2,), so the
    # "parallel" batch axis genuinely has 2 even steps for v7x's two TCs.
    B, IN, OUT = 1024, 2, 1

    # Demo inputs built directly in the lane-dense (IN, B) layout the fast path
    # expects, so no relayout passes sit in front of the kernel.
    xt = jax.random.normal(kx, (IN, B), dtype=jnp.float32)
    w = jax.random.normal(kw, (OUT, IN), dtype=jnp.float32) * 0.5
    b = jax.random.normal(kb, (OUT,), dtype=jnp.float32) * 0.1

    y_lane = jax.block_until_ready(linear_forward_lane_dense(xt, w, b))
    assert y_lane.shape == (1, B)

    # Also exercise the PyTorch-layout wrapper once (same math, x = xt.T).
    x = xt.T
    y = jax.block_until_ready(linear_forward(x, w, b))
    assert y.shape == (B, OUT)

    # Reference: the PyTorch forward, y = x @ W.T + b.
    y_ref = x @ w.T + b
    assert jnp.allclose(y, y_ref, atol=1e-5, rtol=1e-5)
    assert jnp.allclose(y_lane.reshape(B, OUT), y_ref, atol=1e-5, rtol=1e-5)

    print("KERNEL_OK")
</pallas_src>

<mosaic_0001>
module attributes {stable_mosaic.version = 11 : i64} {
  func.func @linear_kernel(%arg0: i32, %arg1: memref<2xf32, #tpu.memory_space<smem>>, %arg2: memref<1xf32, #tpu.memory_space<smem>>, %arg3: memref<2x512xf32, #tpu.memory_space<vmem>>, %arg4: memref<1x512xf32, #tpu.memory_space<vmem>>) attributes {dimension_semantics = [#tpu.dimension_semantics<parallel>], iteration_bounds = array<i64: 2>, scalar_prefetch = 0 : i64, scratch_operands = 0 : i64, tpu.core_type = #tpu.core_type<tc>, window_params = [{transform_indices = @transform_0, window_bounds = array<i64: 2>}, {transform_indices = @transform_1, window_bounds = array<i64: 1>}, {transform_indices = @transform_2, window_bounds = array<i64: 2, 512>}, {transform_indices = @transform_3, window_bounds = array<i64: 1, 512>}]} {
    %c0 = arith.constant 0 : index
    %c0_0 = arith.constant 0 : index
    %0 = vector.load %arg3[%c0, %c0_0] : memref<2x512xf32, #tpu.memory_space<vmem>>, vector<1x512xf32>
    %c0_1 = arith.constant 0 : index
    %1 = memref.load %arg1[%c0_1] : memref<2xf32, #tpu.memory_space<smem>>
    %2 = vector.broadcast %1 : f32 to vector<1x512xf32>
    %3 = arith.mulf %0, %2 : vector<1x512xf32>
    %c1 = arith.constant 1 : index
    %c0_2 = arith.constant 0 : index
    %4 = vector.load %arg3[%c1, %c0_2] : memref<2x512xf32, #tpu.memory_space<vmem>>, vector<1x512xf32>
    %c1_3 = arith.constant 1 : index
    %5 = memref.load %arg1[%c1_3] : memref<2xf32, #tpu.memory_space<smem>>
    %6 = vector.broadcast %5 : f32 to vector<1x512xf32>
    %7 = arith.mulf %4, %6 : vector<1x512xf32>
    %8 = arith.addf %3, %7 : vector<1x512xf32>
    %c0_4 = arith.constant 0 : index
    %9 = memref.load %arg2[%c0_4] : memref<1xf32, #tpu.memory_space<smem>>
    %10 = vector.broadcast %9 : f32 to vector<1x512xf32>
    %11 = arith.addf %8, %10 : vector<1x512xf32>
    %c0_5 = arith.constant 0 : index
    %c0_6 = arith.constant 0 : index
    %12 = vector.load %arg4[%c0_5, %c0_6] : memref<1x512xf32, #tpu.memory_space<vmem>>, vector<1x512xf32>
    tpu.vector_store %arg4[%c0_5, %c0_6], %11 {strides = array<i32>} : memref<1x512xf32, #tpu.memory_space<vmem>>, vector<1x512xf32>,
    return
  }
  func.func @transform_0(%arg0: i32) -> i32 {
    %c0_i32 = arith.constant 0 : i32
    %c0_i32_0 = arith.constant 0 : i32
    return %c0_i32 : i32
  }
  func.func @transform_1(%arg0: i32) -> i32 {
    %c0_i32 = arith.constant 0 : i32
    %c0_i32_0 = arith.constant 0 : i32
    return %c0_i32 : i32
  }
  func.func @transform_2(%arg0: i32) -> (i32, i32) {
    %c0_i32 = arith.constant 0 : i32
    %c0_i32_0 = arith.constant 0 : i32
    return %c0_i32, %arg0 : i32, i32
  }
  func.func @transform_3(%arg0: i32) -> (i32, i32) {
    %c0_i32 = arith.constant 0 : i32
    %c0_i32_0 = arith.constant 0 : i32
    return %c0_i32, %arg0 : i32, i32
  }
}

</mosaic_0001>

<bundles_post_ra>
// kernel: tpu_custom_call.1
= control target key start
LH: loop header
LB: loop body
LE: loop exit
PB: predicated region body
PF: predicated region fallthrough
CT: control target
= control target key end

     0   :  { %s708_s0 = inlined_call_operand.vmem [shape: f32[2], index: 0, kind: input, shape index: {}]   ;;  %s709_s1 = inlined_call_operand.<no memory space> [shape: f32[1], index: 1, kind: input, shape index: {}]   ;;  %s710_s2 = inlined_call_operand.hbm [shape: f32[2,1024], index: 2, kind: input, shape index: {}]   ;;  %s711_s3 = inlined_call_operand.hbm [shape: f32[1,1024], index: 3, kind: output, shape index: {}]  }
   0x1   :  { %8 = sst [smem:[#allocation2]] %s709_s1 }
   0x2   :  { %9 = vsyncpa [#allocation6], 0 }
   0x3   :  { %10 = vsyncpa [#allocation4], 0 }
   0x4   :  { %12 = vsyncpa [#allocation4 + $0x1], 0 }
   0x5   :  { %13 = vsyncpa [#allocation5], 0 }
   0x6   :  { %15 = vsyncpa [#allocation5 + $0x1], 0  ;;  %s535_s14 = smov 0   ;;  %s537_s15 = smov 0  }
   0x7   :  { %s539_s16 = smov 0   ;;  %s541_s17 = smov 0  }
   0x8 LB: > { %s556_s1 = sadd.s32 4294967295, %s507_s17   ;;  %s319_s18 = sadd.s32 4294967294, %s507_s17   ;;  %s507_s17 = sphi %s541_s17, %s734_s17   ;;  %s503_s16 = sphi %s539_s16, %s733_s16   ;;  %s499_s15 = sphi %s537_s15, %s732_s15   ;;  %s495_s14 = sphi %s535_s14, %s731_s14  }
   0x9   : > { %p83_p0 = scmp.ne.s32.totalorder %s499_s15, %s495_s14  ;;  %p712_p1 = scmp.eq.s32.totalorder %s556_s1, 0 }
   0xa   : > { %p113_p3 = scmp.eq.s32.totalorder %s319_s18, 1  ;;  %p320_p5 = scmp.ge.s32.totalorder %s507_s17, 1 }
   0xb   : > { %p565_p4 = por %p712_p1, %p83_p0  ;;  %p120_p7 = scmp.lt.s32.totalorder %s507_s17, 3 }
   0xc   : > { %p570_p6 = por %p113_p3, %p83_p0  ;;  %s133_s23 = sshll.u32 %s708_s0, 4  ;;  %s134_s23 = int_to_ptr.vmem [resolvable:$true] %s133_s23 }
   0xd   : > { %s716_s19 = scalar_select %p565_p4, 1, 0 }
   0xe   : > { %s717_s20 = scalar_select %p570_p6, 1, 0 }
   0xf   : > { %p578_p8 = pnand %p320_p5, %p120_p7  ;;  %s586_s25 = sadd.s32 1, %s507_s17  }
  0x10   : > { %s67_s27 = ssub.s32 %s507_s17, %s586_s25  ;;  %s70_s29 = sadd.s32 1, %s503_s16 }
  0x11   : > { %s718_s24 = scalar_select %p578_p8, 1, 0 }
  0x12   : > { %p347_p10 = pneg %p578_p8  ;;  %p596_p12 = scmp.eq.s32.totalorder %s67_s27, 0 }
  0x13   : > { %p77_p13 = scmp.ne.s32.totalorder %s503_s16, %s499_s15  ;;  %s396_s30 = scalar_lea.vmem %s134_s23, 16 }
  0x14   : > { %p590_p11 = pnand %p347_p10, %p712_p1  ;;  %p397_p0 = scmp.ne.s32.totalorder %s134_s23, %s396_s30 }
  0x15   : > { %p404_p9 = scmp.lt.s32.totalorder %s134_s23, %s134_s23  ;;  %p405_p2 = scmp.lt.s32.totalorder %s396_s30, %s396_s30 }
  0x16   : > { %p398_p3 = pneg %p590_p11 }
  0x17   : > { %p406_p10 = por %p405_p2, %p404_p9 }
  0x18   : > { %p399_p5 = pnand %p398_p3, %p397_p0 }
  0x1a   : > { %p400_p7 = pneg %p399_p5 }
  0x1c   : > { %p407_p1 = pnand %p406_p10, %p400_p7 }
  0x1e   : > { %410 = shalt.err (!%p407_p1)
}
  0x1f   : > { %s509_s4 = smov [#allocation3]   ;;  %p78_p2 = scmp.eq.s32.totalorder %s507_s17, 0 }
  0x20   : > { %350 = dma.vmem_to_smem (!%p590_p11), %s134_s23, 16, %s509_s4, [#allocation6]  }
  0x21   : > { %s610_s5 = scalar_select %p596_p12, %s503_s16, %s70_s29  }
  0x22   : > { %p721_p1 = scmp.eq.s32.totalorder %s556_s1, 1  ;;  %p360_p0 = scmp.lt.s32.totalorder %s507_s17, 2 }
  0x23   : > { %s147_s7 = sand.u32 1, %s503_s16   ;;  %p79_p3 = por %p78_p2, %p77_p13 }
  0x24   : > { %p618_p9 = por %p721_p1, %p77_p13  ;;  %s323_s8 = sshll.u32 %s147_s7, 3 }
  0x25   : > { %s337_s9 = sshll.u32 %s507_s17, 7  ;;  %s151_s13 = scalar_lea.vmem [#allocation7], %s323_s8 }
  0x26   : > { %s722_s6 = scalar_select %p618_p9, 1, 0 }
  0x27   : > { %s631_s12 = scalar_lea.hbm %s710_s2, %s337_s9  ;;  %s159_s18 = sshll.u32 %s151_s13, 4  ;;  %s160_s18 = int_to_ptr.vmem [resolvable:$true] %s159_s18 }
  0x28   : > { %p633_p11 = pnand %p360_p0, %p79_p3  ;;  %s148_s22 = scalar_lea.sflag [#allocation4], %s147_s7 }
  0x29   : > { %s411_s23 = scalar_lea.hbm %s631_s12, 128  ;;  %s416_s28 = scalar_lea.hbm %s710_s2, 256 }
  0x2a   : > { %p412_p12 = scmp.ne.s32.totalorder %s631_s12, %s411_s23  ;;  %p413_p13 = pneg %p633_p11 }
  0x2b   : > { %p417_p10 = scmp.lt.s32.totalorder %s631_s12, %s710_s2  ;;  %p418_p2 = scmp.lt.s32.totalorder %s416_s28, %s411_s23 }
  0x2c   : > { %p414_p5 = pnand %p413_p13, %p412_p12 }
  0x2d   : > { %p419_p1 = por %p418_p2, %p417_p10 }
  0x2e   : > { %p415_p7 = pneg %p414_p5 }
  0x30   : > { %p420_p0 = pnand %p419_p1, %p415_p7 }
  0x32   : > { %423 = shalt.err (!%p420_p0)
}
  0x33   : > { %s424_s4 = scalar_lea.vmem %s160_s18, 128  ;;  %s510_s7 = smov [#allocation7]  }
  0x34   : > { %p425_p3 = scmp.ne.s32.totalorder %s160_s18, %s424_s4  ;;  %s429_s8 = sshll.u32 %s510_s7, 4  ;;  %s430_s8 = int_to_ptr.vmem [resolvable:$false] %s429_s8 }
  0x35   : > { %s431_s9 = scalar_lea.vmem %s430_s8, 256  ;;  %p432_p12 = scmp.lt.s32.totalorder %s160_s18, %s430_s8 }
  0x36   : > { %p427_p6 = pnand %p425_p3, %p413_p13  ;;  %p433_p5 = scmp.lt.s32.totalorder %s431_s9, %s424_s4 }
  0x38   : > { %p428_p9 = pneg %p427_p6  ;;  %p434_p4 = por %p433_p5, %p432_p12 }
  0x3a   : > { %p435_p8 = pnand %p434_p4, %p428_p9 }
  0x3c   : > { %438 = shalt.err (!%p435_p8)
}
  0x3d   : > { %354 = dma.hbm_to_vmem [thread:$0]  (!%p633_p11), %s631_s12, 128, %s160_s18, %s148_s22  }
  0x3e   : > { %p724_p7 = scmp.ne.s32.totalorder %s718_s24, 0 }
  0x3f   : > { %p725_p10 = scmp.eq.s32.totalorder (!%p724_p7), %s556_s1, 0 }
  0x40   : > { %168 = sbr.rel (%p724_p7) target bundleno = 103 (0x67), region = 32 }
  0x45   : > { %482 = dma.done.wait (%p725_p10), [#allocation6], 16   ;;  %p726_p6 = pmov %p725_p10 }
  0x46   : > { %s658_s10 = sand.u32 1, %s499_s15   ;;  %p727_p4 = scmp.ne.s32.totalorder %s716_s19, 0 }
  0x47   : > { %484 = vsyncadd (%p726_p6), [#allocation6], 4294967280  ;;  %s328_s11 = sshll.u32 %s658_s10, 3  ;;  %s175_s13 = scalar_lea.sflag [#allocation4], %s658_s10 }
  0x48   : > { %s178_s21 = scalar_lea.vmem [#allocation7], %s328_s11 }
  0x49   : > { %486 = dma.done.wait (%p727_p4), %s175_s13, 128  }
  0x4a   : > { %488 = vsyncadd (%p727_p4), %s175_s13, 4294967168 }
  0x4b   : > { %183 = sfence }
  0x4c   : > { %s205_s24 = sld [smem:[#allocation3]]  ;;  %s329_s18 = sshll.u32 %s658_s10, 2  ;;  %v204_v0 = vld [vmem:[%s178_s21] ss:$2 sm:$0xf]  ;;  %v217_v5 = vlaneseq }
  0x4d   : > { %s331_s12 = sld [smem:[#allocation3 + $0x1]]  ;;  %v330_v1 = vld [vmem:[%s178_s21 + $0x1] ss:$2 sm:$0xf]  ;;  %s201_s23 = scalar_lea.vmem [#allocation8], %s329_s18 }
  0x4e   : > { %s214_s22 = sld [smem:[#allocation2]]  ;;  %s237_s26 = sshll.u32 %s201_s23, 4  ;;  %vm219_vm0 = vcmp.lt.s32.totalorder %v217_v5, 512  ;;  %s668_s26 = int_to_ptr.vmem [resolvable:$true] %s237_s26 }
  0x4f   : > { %s338_s19 = sshll.u32 %s556_s1, 6  ;;  %s223_s30 = scalar_lea.sflag [#allocation5], %s658_s10 }
  0x50   : > { %s235_s29 = scalar_lea.hbm %s711_s3, %s338_s19  ;;  %s439_s4 = scalar_lea.vmem %s668_s26, 64 }
  0x51   : > { %p440_p8 = scmp.ne.s32.totalorder %s668_s26, %s439_s4  ;;  %p728_p9 = scmp.ne.s32.totalorder %s722_s6, 0 }
  0x52   : > { %v206_v2 = vstv %s205_s24  ;;  %s511_s1 = smov [#allocation8]  }
  0x53   : > { %v207_v3 = vmul.f32 %v206_v2, %v204_v0  ;;  %v211_v4 = vstv %s331_s12  ;;  %p441_p11 = pnand %p440_p8, %p728_p9  ;;  %s443_s7 = sshll.u32 %s511_s1, 4  ;;  %s444_s7 = int_to_ptr.vmem [resolvable:$false] %s443_s7 }
  0x54   : > { %v212_v6 = vmul.f32 %v330_v1, %v211_v4  ;;  %v215_v7 = vstv %s214_s22  ;;  %s445_s8 = scalar_lea.vmem %s444_s7, 128  ;;  %p446_p2 = scmp.lt.s32.totalorder %s668_s26, %s444_s7 }
  0x55   : > { %p442_p13 = pneg %p441_p11  ;;  %p447_p1 = scmp.lt.s32.totalorder %s445_s8, %s439_s4 }
  0x56   : > { %v213_v8 = vadd.f32 %v212_v6, %v207_v3 }
  0x57   : > { %p448_p0 = por %p447_p1, %p446_p2 }
  0x58   : > { %v216_v9 = vadd.f32 %v215_v7, %v213_v8 }
  0x59   : > { %p449_p3 = pnand %p448_p0, %p442_p13 }
  0x5a   : > { %221 = vst.msk [vmem:[%s201_s23] sm:$0xf] %vm219_vm0, %v216_v9 }
  0x5b   : > { %452 = shalt.err (!%p449_p3)
}
  0x5c   : > { %s453_s9 = scalar_lea.hbm %s235_s29, 64  ;;  %s457_s13 = scalar_lea.hbm %s711_s3, 128 }
  0x5d   : > { %p454_p12 = scmp.ne.s32.totalorder %s235_s29, %s453_s9  ;;  %p458_p10 = scmp.lt.s32.totalorder %s235_s29, %s711_s3 }
  0x5e   : > { %p459_p6 = scmp.lt.s32.totalorder %s457_s13, %s453_s9 }
  0x5f   : > { %p455_p5 = pnand %p454_p12, %p728_p9 }
  0x60   : > { %p460_p4 = por %p459_p6, %p458_p10 }
  0x61   : > { %p456_p7 = pneg %p455_p5 }
  0x63   : > { %p461_p8 = pnand %p460_p4, %p456_p7 }
  0x65   : > { %464 = shalt.err (!%p461_p8)
}
  0x66   : > { %345 = dma.vmem_to_hbm [thread:$0]  (%p728_p9), %s668_s26, 64, %s235_s29, %s223_s30  }
  0x67 PF: > { %s249_s12 = sand.u32 1, %s495_s14   ;;  %p729_p11 = scmp.ne.s32.totalorder %s717_s20, 0 }
  0x68   : > { %p730_p13 = scmp.ge.s32.totalorder %s507_s17, 2  ;;  %s250_s18 = scalar_lea.sflag [#allocation5], %s249_s12 }
  0x6a   : > { %p356_p2 = pnand %p730_p13, %p729_p11 }
  0x6c   : > { %p357_p1 = pneg %p356_p2 }
  0x6e   : > { %490 = dma.done.wait (%p357_p1), %s250_s18, 64  }
  0x6f   : > { %492 = vsyncadd (%p357_p1), %s250_s18, 4294967232  ;;  %p18_p0 = scmp.ge.s32.totalorder %s586_s25, 4   ;;  %s731_s14 = smov %s499_s15 }
  0x70   : > { %s732_s15 = smov %s503_s16  ;;  %s733_s16 = smov %s610_s5 }
  0x71   : > { %s734_s17 = smov %s586_s25  ;;  %20 = sbr.rel (!%p18_p0) target bundleno = 8 (0x8), region = 83 }
  0x76   :  { %255 = vsyncpa [#allocation4], 1 }
  0x77   :  { %257 = vsyncpa [#allocation4 + $0x1], 1 }
  0x78   :  { %258 = vsyncpa [#allocation5], 1 }
  0x79   :  { %260 = vsyncpa [#allocation5 + $0x1], 1 }
  0x7a   :  { %261 = vsyncpa [#allocation6], 1 }
  0x7b   :  { %263 = vsyncpa [#allocation6 + $0x1], 1 }

</bundles_post_ra>
